<compile_context>
chip_gen: v7x
topology: tpu7x:2x2x1
jax: 0.10.0
libtpu: 0.0.40
codegen_flags: <defaults>
</compile_context>

<pallas_src>
import numpy as np
import jax
import jax.numpy as jnp
from jax.experimental import pallas as pl
from jax.experimental.pallas import tpu as pltpu

H = 96
W = 96
C = 3
WC = W * C                      # 288 lanes after flattening (w, c)
CROP_BLK = 16                   # H-block rows 80..95: 8-aligned superset of rows 84..93
CROP_BLK_IDX = 80 // CROP_BLK   # block index 5 along the H axis
ROW_LO = 84 - 80                # sensor window start (crop-relative)
ROW_HI = 94 - 80                # sensor window end (exclusive, crop-relative)
ROW88 = 88 - 80                 # steering / gyroscope row (crop-relative)
FEAT = 8                        # 7 sensor features padded to 8
ACTION_SIZE = 5
MAX_BATCH_TILE = 128            # 2 x (128,16,288) f32 input buffers ~= 4.7 MiB


def _selection_matrices():
    """Static 0/1 matrices mapping flattened lane (w*C + c) -> sensor feature.
    m_all multiplies the count summed over rows 84..93 (speed + 4 ABS);
    m_row multiplies row 88 only (steering + gyroscope)."""
    m_all = np.zeros((WC, FEAT), np.float32)
    m_row = np.zeros((WC, FEAT), np.float32)
    m_all[13 * C + 0, 0] = 1.0                        # speed: w=13, ch 0
    for j, w in enumerate(range(18, 25, 2)):          # abs: w=18,20,22,24, ch 2
        m_all[w * C + 2, 1 + j] = 1.0
    for w in range(38, 58):                           # steering: row 88, ch 1
        m_row[w * C + 1, 5] = 1.0
    for w in range(58, 86):                           # gyroscope: row 88, ch 0
        m_row[w * C + 0, 6] = 1.0
    return m_all, m_row


_M_ALL_NP, _M_ROW_NP = _selection_matrices()


def dqn_kernel(x_ref, m_all_ref, m_row_ref, w_ref, b_ref, q_ref, sens_ref):
    x = x_ref[...]                                     # (TB, 16, 288) f32
    eq = (x == 255.0).astype(jnp.float32)              # one compare feeds all 7 sensors

    # Row masks (crop-relative): rows 4..13 for speed/ABS, row 8 for steer/gyro.
    r = jax.lax.broadcasted_iota(jnp.int32, (CROP_BLK, WC), 0)
    in_win = jnp.logical_and(r >= ROW_LO, r < ROW_HI)
    sum_h = jnp.sum(jnp.where(in_win, eq, 0.0), axis=1)       # (TB, 288)
    row88 = jnp.sum(jnp.where(r == ROW88, eq, 0.0), axis=1)   # (TB, 288)

    # All seven masked counts via two tiny 0/1 matmuls on the otherwise-idle
    # MXU (exact in f32 accumulation: products are 0/1, counts <= 28).
    sensors = (jnp.dot(sum_h, m_all_ref[...], preferred_element_type=jnp.float32)
               + jnp.dot(row88, m_row_ref[...], preferred_element_type=jnp.float32))
    sens_ref[...] = sensors.astype(jnp.int32)

    # Synthetic linear Q-head over the extracted sensor features.
    q_ref[...] = (jnp.dot(sensors, w_ref[...], preferred_element_type=jnp.float32)
                  + b_ref[...])


def dqn_forward(observation, w, b):
    """observation: (B, 96, 96, 3) f32 NHWC pixels.
    Returns (q_values (B, A) f32,
             (speed (B,1), abs_sensors (B,4), steering (B,1), gyroscope (B,1)) int32)."""
    B = observation.shape[0]
    A = w.shape[1]

    # Free reshape (contiguous merge of trailing dims): (B, 96, 96, 3) -> (B, 96, 288).
    # The H crop is done by the BlockSpec below, so no separate copy kernel runs.
    obs = observation.reshape(B, H, WC)

    m_all = jnp.asarray(_M_ALL_NP)
    m_row = jnp.asarray(_M_ROW_NP)

    tb = min(B, MAX_BATCH_TILE)
    grid = (pl.cdiv(B, tb),)

    q, sensors = pl.pallas_call(
        dqn_kernel,
        out_shape=(jax.ShapeDtypeStruct((B, A), jnp.float32),
                   jax.ShapeDtypeStruct((B, FEAT), jnp.int32)),
        grid=grid,
        in_specs=[pl.BlockSpec((tb, CROP_BLK, WC), lambda i: (i, CROP_BLK_IDX, 0)),
                  pl.BlockSpec((WC, FEAT), lambda i: (0, 0)),
                  pl.BlockSpec((WC, FEAT), lambda i: (0, 0)),
                  pl.BlockSpec((FEAT, A), lambda i: (0, 0)),
                  pl.BlockSpec((1, A), lambda i: (0, 0))],
        out_specs=(pl.BlockSpec((tb, A), lambda i: (i, 0)),
                   pl.BlockSpec((tb, FEAT), lambda i: (i, 0))),
        compiler_params=pltpu.CompilerParams(
            dimension_semantics=("parallel",)),
    )(obs, m_all, m_row, w, b)

    speed = sensors[:, 0:1]
    abs_sensors = sensors[:, 1:5]
    steering = sensors[:, 5:6]
    gyroscope = sensors[:, 6:7]
    return q, (speed, abs_sensors, steering, gyroscope)


if __name__ == "__main__":
    key = jax.random.PRNGKey(0)
    k_obs, k_w, k_b = jax.random.split(key, 3)

    B = 2
    # deterministic pixel values in {0, 127.5, 255} so '== 255' has real hits
    obs = jax.random.randint(k_obs, (B, H, W, C), 0, 3).astype(jnp.float32) * 127.5
    w = jax.random.normal(k_w, (FEAT, ACTION_SIZE), jnp.float32) * 0.1
    b = jax.random.normal(k_b, (1, ACTION_SIZE), jnp.float32) * 0.1

    q, (speed, abs_sensors, steering, gyro) = jax.block_until_ready(
        jax.jit(dqn_forward)(obs, w, b))

    # pure-JAX reference for extract_sensor_values (PyTorch semantics, NHWC)
    speed_ref = (obs[:, 84:94, 13, 0] == 255).sum(axis=1, keepdims=True)
    abs_ref = (obs[:, 84:94, 18:25:2, 2] == 255).reshape(B, 10, 4).sum(axis=1)
    steer_ref = (obs[:, 88, 38:58, 1] == 255).sum(axis=1, keepdims=True)
    gyro_ref = (obs[:, 88, 58:86, 0] == 255).sum(axis=1, keepdims=True)

    assert jnp.array_equal(speed, speed_ref.astype(jnp.int32)), "speed mismatch"
    assert jnp.array_equal(abs_sensors, abs_ref.astype(jnp.int32)), "abs mismatch"
    assert jnp.array_equal(steering, steer_ref.astype(jnp.int32)), "steering mismatch"
    assert jnp.array_equal(gyro, gyro_ref.astype(jnp.int32)), "gyro mismatch"

    feats_ref = jnp.concatenate(
        [speed_ref, abs_ref, steer_ref, gyro_ref,
         jnp.zeros((B, 1), speed_ref.dtype)], axis=-1).astype(jnp.float32)
    q_ref = feats_ref @ w + b
    assert jnp.allclose(q, q_ref, atol=1e-5, rtol=1e-5), "q-values mismatch"

    print("KERNEL_OK")
</pallas_src>

<mosaic_0001>
module attributes {stable_mosaic.version = 11 : i64} {
  func.func @dqn_kernel(%arg0: i32, %arg1: memref<2x16x288xf32, #tpu.memory_space<vmem>>, %arg2: memref<288x8xf32, #tpu.memory_space<vmem>>, %arg3: memref<288x8xf32, #tpu.memory_space<vmem>>, %arg4: memref<8x5xf32, #tpu.memory_space<vmem>>, %arg5: memref<1x5xf32, #tpu.memory_space<vmem>>, %arg6: memref<2x5xf32, #tpu.memory_space<vmem>>, %arg7: memref<2x8xi32, #tpu.memory_space<vmem>>) attributes {dimension_semantics = [#tpu.dimension_semantics<parallel>], iteration_bounds = array<i64: 1>, scalar_prefetch = 0 : i64, scratch_operands = 0 : i64, tpu.core_type = #tpu.core_type<tc>, window_params = [{transform_indices = @transform_0, window_bounds = array<i64: 2, 16, 288>}, {pipeline_mode = #tpu.pipeline_mode<synchronous>, transform_indices = @transform_1, window_bounds = array<i64: 288, 8>}, {pipeline_mode = #tpu.pipeline_mode<synchronous>, transform_indices = @transform_2, window_bounds = array<i64: 288, 8>}, {pipeline_mode = #tpu.pipeline_mode<synchronous>, transform_indices = @transform_3, window_bounds = array<i64: 8, 5>}, {pipeline_mode = #tpu.pipeline_mode<synchronous>, transform_indices = @transform_4, window_bounds = array<i64: 1, 5>}, {transform_indices = @transform_5, window_bounds = array<i64: 2, 5>}, {transform_indices = @transform_6, window_bounds = array<i64: 2, 8>}]} {
    %c0 = arith.constant 0 : index
    %c0_0 = arith.constant 0 : index
    %c0_1 = arith.constant 0 : index
    %0 = vector.load %arg1[%c0, %c0_0, %c0_1] : memref<2x16x288xf32, #tpu.memory_space<vmem>>, vector<2x16x288xf32>
    %cst = arith.constant 2.550000e+02 : f32
    %1 = vector.broadcast %cst : f32 to vector<2x16x288xf32>
    %2 = arith.cmpf oeq, %0, %1 : vector<2x16x288xf32>
    %3 = arith.extui %2 : vector<2x16x288xi1> to vector<2x16x288xi32>
    %4 = arith.sitofp %3 : vector<2x16x288xi32> to vector<2x16x288xf32>
    %5 = tpu.iota {dimensions = array<i32: 0>} : vector<16x288xi32>
    %c4_i32 = arith.constant 4 : i32
    %6 = vector.broadcast %c4_i32 : i32 to vector<16x288xi32>
    %7 = arith.cmpi sge, %5, %6 : vector<16x288xi32>
    %c14_i32 = arith.constant 14 : i32
    %8 = vector.broadcast %c14_i32 : i32 to vector<16x288xi32>
    %9 = arith.cmpi slt, %5, %8 : vector<16x288xi32>
    %10 = arith.andi %7, %9 : vector<16x288xi1>
    %cst_2 = arith.constant 0.000000e+00 : f32
    %11 = vector.shape_cast %10 : vector<16x288xi1> to vector<1x16x288xi1>
    %12 = vector.broadcast %11 : vector<1x16x288xi1> to vector<2x16x288xi1>
    %13 = vector.broadcast %cst_2 : f32 to vector<2x16x288xf32>
    %14 = arith.select %12, %4, %13 : vector<2x16x288xi1>, vector<2x16x288xf32>
    %cst_3 = arith.constant dense<0.000000e+00> : vector<2x288xf32>
    %15 = vector.multi_reduction <add>, %14, %cst_3 [1] : vector<2x16x288xf32> to vector<2x288xf32>
    %c8_i32 = arith.constant 8 : i32
    %16 = vector.broadcast %c8_i32 : i32 to vector<16x288xi32>
    %17 = arith.cmpi eq, %5, %16 : vector<16x288xi32>
    %cst_4 = arith.constant 0.000000e+00 : f32
    %18 = vector.shape_cast %17 : vector<16x288xi1> to vector<1x16x288xi1>
    %19 = vector.broadcast %18 : vector<1x16x288xi1> to vector<2x16x288xi1>
    %20 = vector.broadcast %cst_4 : f32 to vector<2x16x288xf32>
    %21 = arith.select %19, %4, %20 : vector<2x16x288xi1>, vector<2x16x288xf32>
    %cst_5 = arith.constant dense<0.000000e+00> : vector<2x288xf32>
    %22 = vector.multi_reduction <add>, %21, %cst_5 [1] : vector<2x16x288xf32> to vector<2x288xf32>
    %c0_6 = arith.constant 0 : index
    %c0_7 = arith.constant 0 : index
    %23 = vector.load %arg2[%c0_6, %c0_7] : memref<288x8xf32, #tpu.memory_space<vmem>>, vector<288x8xf32>
    %cst_8 = arith.constant dense<0.000000e+00> : vector<2x8xf32>
    %24 = tpu.matmul %15, %23, %cst_8 {dimension_numbers = #tpu.dot_dimension_numbers<[1], [0], [0], [1], [0, 0, 1, 1], [], []>} : vector<2x288xf32>, vector<288x8xf32>, vector<2x8xf32> -> vector<2x8xf32>
    %c0_9 = arith.constant 0 : index
    %c0_10 = arith.constant 0 : index
    %25 = vector.load %arg3[%c0_9, %c0_10] : memref<288x8xf32, #tpu.memory_space<vmem>>, vector<288x8xf32>
    %cst_11 = arith.constant dense<0.000000e+00> : vector<2x8xf32>
    %26 = tpu.matmul %22, %25, %cst_11 {dimension_numbers = #tpu.dot_dimension_numbers<[1], [0], [0], [1], [0, 0, 1, 1], [], []>} : vector<2x288xf32>, vector<288x8xf32>, vector<2x8xf32> -> vector<2x8xf32>
    %27 = arith.addf %24, %26 : vector<2x8xf32>
    %28 = arith.fptosi %27 : vector<2x8xf32> to vector<2x8xi32>
    %c0_12 = arith.constant 0 : index
    %c0_13 = arith.constant 0 : index
    %29 = vector.load %arg7[%c0_12, %c0_13] : memref<2x8xi32, #tpu.memory_space<vmem>>, vector<2x8xi32>
    tpu.vector_store %arg7[%c0_12, %c0_13], %28 {strides = array<i32>} : memref<2x8xi32, #tpu.memory_space<vmem>>, vector<2x8xi32>,
    %c0_14 = arith.constant 0 : index
    %c0_15 = arith.constant 0 : index
    %30 = vector.load %arg4[%c0_14, %c0_15] : memref<8x5xf32, #tpu.memory_space<vmem>>, vector<8x5xf32>
    %cst_16 = arith.constant dense<0.000000e+00> : vector<2x5xf32>
    %31 = tpu.matmul %27, %30, %cst_16 {dimension_numbers = #tpu.dot_dimension_numbers<[1], [0], [0], [1], [0, 0, 1, 1], [], []>} : vector<2x8xf32>, vector<8x5xf32>, vector<2x5xf32> -> vector<2x5xf32>
    %c0_17 = arith.constant 0 : index
    %c0_18 = arith.constant 0 : index
    %32 = vector.load %arg5[%c0_17, %c0_18] : memref<1x5xf32, #tpu.memory_space<vmem>>, vector<1x5xf32>
    %33 = vector.broadcast %32 : vector<1x5xf32> to vector<2x5xf32>
    %34 = arith.addf %31, %33 : vector<2x5xf32>
    %c0_19 = arith.constant 0 : index
    %c0_20 = arith.constant 0 : index
    %35 = vector.load %arg6[%c0_19, %c0_20] : memref<2x5xf32, #tpu.memory_space<vmem>>, vector<2x5xf32>
    tpu.vector_store %arg6[%c0_19, %c0_20], %34 {strides = array<i32>} : memref<2x5xf32, #tpu.memory_space<vmem>>, vector<2x5xf32>,
    return
  }
  func.func @transform_0(%arg0: i32) -> (i32, i32, i32) {
    %c5_i32 = arith.constant 5 : i32
    %c0_i32 = arith.constant 0 : i32
    %c0_i32_0 = arith.constant 0 : i32
    return %arg0, %c5_i32, %c0_i32 : i32, i32, i32
  }
  func.func @transform_1(%arg0: i32) -> (i32, i32) {
    %c0_i32 = arith.constant 0 : i32
    %c0_i32_0 = arith.constant 0 : i32
    %c0_i32_1 = arith.constant 0 : i32
    return %c0_i32, %c0_i32_0 : i32, i32
  }
  func.func @transform_2(%arg0: i32) -> (i32, i32) {
    %c0_i32 = arith.constant 0 : i32
    %c0_i32_0 = arith.constant 0 : i32
    %c0_i32_1 = arith.constant 0 : i32
    return %c0_i32, %c0_i32_0 : i32, i32
  }
  func.func @transform_3(%arg0: i32) -> (i32, i32) {
    %c0_i32 = arith.constant 0 : i32
    %c0_i32_0 = arith.constant 0 : i32
    %c0_i32_1 = arith.constant 0 : i32
    return %c0_i32, %c0_i32_0 : i32, i32
  }
  func.func @transform_4(%arg0: i32) -> (i32, i32) {
    %c0_i32 = arith.constant 0 : i32
    %c0_i32_0 = arith.constant 0 : i32
    %c0_i32_1 = arith.constant 0 : i32
    return %c0_i32, %c0_i32_0 : i32, i32
  }
  func.func @transform_5(%arg0: i32) -> (i32, i32) {
    %c0_i32 = arith.constant 0 : i32
    %c0_i32_0 = arith.constant 0 : i32
    return %arg0, %c0_i32 : i32, i32
  }
  func.func @transform_6(%arg0: i32) -> (i32, i32) {
    %c0_i32 = arith.constant 0 : i32
    %c0_i32_0 = arith.constant 0 : i32
    return %arg0, %c0_i32 : i32, i32
  }
}

</mosaic_0001>

<bundles_post_ra>
// kernel: dqn_forward.1
= control target key start
LH: loop header
LB: loop body
LE: loop exit
PB: predicated region body
PF: predicated region fallthrough
CT: control target
= control target key end

     0   :  { %v113_v30 = vlaneseq  ;;  %vm327_vm7 = vcmask 1041409   ;;  %s1456_s0 = inlined_call_operand.vmem [shape: f32[2,96,288], index: 0, kind: input, shape index: {}]   ;;  %s1457_s1 = inlined_call_operand.vmem [shape: f32[288,8], index: 1, kind: input, shape index: {}]   ;;  %s1458_s2 = inlined_call_operand.vmem [shape: f32[288,8], index: 2, kind: input, shape index: {}]   ;;  %s1459_s3 = inlined_call_operand.vmem [shape: f32[8,5], index: 3, kind: input, shape index: {}]   ;;  %s1460_s4 = inlined_call_operand.vmem [shape: f32[1,5], index: 4, kind: input, shape index: {}]   ;;  %s1461_s5 = inlined_call_operand.hbm [shape: f32[2,5], index: 5, kind: output, shape index: {0}]   ;;  %s1462_s6 = inlined_call_operand.vmem [shape: s32[2,8], index: 6, kind: output, shape index: {1}]  }
   0x1   :  { %v301_v0 = vld [vmem:[%s1458_s2 + $0x80] sm:$0xff]  ;;  %v302_v1 = vld [vmem:[%s1458_s2 + $0x88] sm:$0xff]  ;;  %v303_v9 = vld [vmem:[%s1458_s2 + $0x90] sm:$0xff] }
   0x2   :  { %v285_v2 = vld [vmem:[%s1458_s2] sm:$0xff]  ;;  %v874_v3 = vpack.c.bf16 %v302_v1, %v301_v0  ;;  %v286_v4 = vld [vmem:[%s1458_s2 + $0x8] sm:$0xff]  ;;  %v304_v10 = vld [vmem:[%s1458_s2 + $0x98] sm:$0xff]  ;;  %v1121_v47 = vshrl.u32 %v113_v30, 7 }
   0x3   :  { %v265_v5 = vld [vmem:[%s1457_s1 + $0x80] sm:$0xff]  ;;  %v266_v6 = vld [vmem:[%s1457_s1 + $0x88] sm:$0xff]  ;;  %v876_v7 = vpack.c.bf16 %v286_v4, %v285_v2  ;;  %v878_v12 = vpack.c.bf16 %v304_v10, %v303_v9  ;;  %v287_v14 = vld [vmem:[%s1458_s2 + $0x10] sm:$0xff] }
   0x4   :  { %v912_v8 = vpack.c.bf16 %v266_v6, %v265_v5  ;;  %v249_v11 = vld [vmem:[%s1457_s1] sm:$0xff]  ;;  %875 = vmatprep.subr.bf16.mxu0 %v874_v3  ;;  %v250_v13 = vld [vmem:[%s1457_s1 + $0x8] sm:$0xff]  ;;  %v288_v15 = vld [vmem:[%s1458_s2 + $0x18] sm:$0xff]  ;;  %v1164_v0 = vadd.s32 8, %v1121_v47  ;;  %vm116_vm1 = vcmp.ge.s32.totalorder %v1121_v47, 4 }
   0x5   :  { %877 = vmatpush3.bf16.msra.mxu0 %v876_v7  ;;  %v914_v16 = vpack.c.bf16 %v250_v13, %v249_v11  ;;  %v880_v17 = vpack.c.bf16 %v288_v15, %v287_v14  ;;  %v267_v18 = vld [vmem:[%s1457_s1 + $0x90] sm:$0xff]  ;;  %v268_v19 = vld [vmem:[%s1457_s1 + $0x98] sm:$0xff]  ;;  %v305_v20 = vld [vmem:[%s1458_s2 + $0xa0] sm:$0xff] }
   0x6   :  { %913 = vmatprep.subr.bf16.mxu1 %v912_v8  ;;  %879 = vmatprep.subr.bf16.mxu0 %v878_v12  ;;  %v916_v21 = vpack.c.bf16 %v268_v19, %v267_v18  ;;  %v306_v22 = vld [vmem:[%s1458_s2 + $0xa8] sm:$0xff]  ;;  %v251_v23 = vld [vmem:[%s1457_s1 + $0x10] sm:$0xff]  ;;  %v252_v24 = vld [vmem:[%s1457_s1 + $0x18] sm:$0xff]  ;;  %vm186_vm0 = vcmp.eq.s32.totalorder %v1164_v0, 8  ;;  %vm119_vm2 = vcmp.lt.s32.totalorder %v1164_v0, 14 }
   0x7   :  { %915 = vmatpush3.bf16.msra.mxu1 %v914_v16  ;;  %v882_v25 = vpack.c.bf16 %v306_v22, %v305_v20  ;;  %v918_v26 = vpack.c.bf16 %v252_v24, %v251_v23  ;;  %v289_v27 = vld [vmem:[%s1458_s2 + $0x20] sm:$0xff]  ;;  %v290_v28 = vld [vmem:[%s1458_s2 + $0x28] sm:$0xff]  ;;  %v307_v32 = vld [vmem:[%s1458_s2 + $0xb0] sm:$0xff] }
   0x8   :  { %v269_v29 = vld [vmem:[%s1457_s1 + $0xa0] sm:$0xff]  ;;  %917 = vmatprep.subr.bf16.mxu1 %v916_v21  ;;  %v270_v31 = vld [vmem:[%s1457_s1 + $0xa8] sm:$0xff]  ;;  %v308_v33 = vld [vmem:[%s1458_s2 + $0xb8] sm:$0xff]  ;;  %v884_v34 = vpack.c.bf16 %v290_v28, %v289_v27 }
   0x9   :  { %881 = vmatpush3.bf16.msra.mxu0 %v880_v17  ;;  %v920_v35 = vpack.c.bf16 %v270_v31, %v269_v29  ;;  %v253_v36 = vld [vmem:[%s1457_s1 + $0x20] sm:$0xff]  ;;  %v254_v37 = vld [vmem:[%s1457_s1 + $0x28] sm:$0xff]  ;;  %v291_v38 = vld [vmem:[%s1458_s2 + $0x30] sm:$0xff]  ;;  %v886_v39 = vpack.c.bf16 %v308_v33, %v307_v32 }
   0xa   :  { %883 = vmatprep.subr.bf16.mxu0 %v882_v25  ;;  %v292_v40 = vld [vmem:[%s1458_s2 + $0x38] sm:$0xff]  ;;  %v271_v41 = vld [vmem:[%s1457_s1 + $0xb0] sm:$0xff]  ;;  %v922_v43 = vpack.c.bf16 %v254_v37, %v253_v36  ;;  %v309_v44 = vld [vmem:[%s1458_s2 + $0xc0] sm:$0xff] }
   0xb   :  { %v272_v42 = vld [vmem:[%s1457_s1 + $0xb8] sm:$0xff]  ;;  %919 = vmatpush3.bf16.msra.mxu1 %v918_v26  ;;  %v310_v45 = vld [vmem:[%s1458_s2 + $0xc8] sm:$0xff]  ;;  %v255_v46 = vld [vmem:[%s1457_s1 + $0x30] sm:$0xff]  ;;  %v888_v52 = vpack.c.bf16 %v292_v40, %v291_v38 }
   0xc   :  { %921 = vmatprep.subr.bf16.mxu1 %v920_v35  ;;  %v924_v48 = vpack.c.bf16 %v272_v42, %v271_v41  ;;  %v256_v49 = vld [vmem:[%s1457_s1 + $0x38] sm:$0xff]  ;;  %v293_v50 = vld [vmem:[%s1458_s2 + $0x40] sm:$0xff]  ;;  %v294_v51 = vld [vmem:[%s1458_s2 + $0x48] sm:$0xff]  ;;  %v890_v56 = vpack.c.bf16 %v310_v45, %v309_v44  ;;  %v983_v35 = vmov 0.0  }
   0xd   :  { %885 = vmatpush3.bf16.msra.mxu0 %v884_v34  ;;  %v273_v53 = vld [vmem:[%s1457_s1 + $0xc0] sm:$0xff]  ;;  %v274_v54 = vld [vmem:[%s1457_s1 + $0xc8] sm:$0xff]  ;;  %v311_v55 = vld [vmem:[%s1458_s2 + $0xd0] sm:$0xff]  ;;  %v926_v60 = vpack.c.bf16 %v256_v49, %v255_v46  ;;  %v892_v5 = vpack.c.bf16 %v294_v51, %v293_v50 }
   0xe   :  { %887 = vmatprep.subr.bf16.mxu0 %v886_v39  ;;  %v312_v57 = vld [vmem:[%s1458_s2 + $0xd8] sm:$0xff]  ;;  %v257_v58 = vld [vmem:[%s1457_s1 + $0x40] sm:$0xff]  ;;  %v258_v59 = vld [vmem:[%s1457_s1 + $0x48] sm:$0xff]  ;;  %v928_v1 = vpack.c.bf16 %v274_v54, %v273_v53 }
   0xf   :  { %923 = vmatpush3.bf16.msra.mxu1 %v922_v43  ;;  %v1153_v61 = vld [vmem:[%s1458_s2 + $0x50] sm:$0xff]  ;;  %v1158_v62 = vld [vmem:[%s1458_s2 + $0x58] sm:$0xff]  ;;  %v1172_v3 = vld [vmem:[%s1458_s2 + $0xe0] sm:$0xff]  ;;  %v894_v9 = vpack.c.bf16 %v312_v57, %v311_v55  ;;  %v930_v13 = vpack.c.bf16 %v258_v59, %v257_v58 }
  0x10   :  { %v275_v63 = vld [vmem:[%s1457_s1 + $0xd0] sm:$0xff]  ;;  %925 = vmatprep.subr.bf16.mxu1 %v924_v48  ;;  %v276_v2 = vld [vmem:[%s1457_s1 + $0xd8] sm:$0xff]  ;;  %v1177_v4 = vld [vmem:[%s1458_s2 + $0xe8] sm:$0xff]  ;;  %v896_v17 = vpack.c.bf16 %v1158_v62, %v1153_v61 }
  0x11   :  { %889 = vmatpush3.bf16.msra.mxu0 %v888_v52  ;;  %v1182_v6 = vld [vmem:[%s1457_s1 + $0x50] sm:$0xff]  ;;  %v1187_v7 = vld [vmem:[%s1457_s1 + $0x58] sm:$0xff]  ;;  %v1192_v8 = vld [vmem:[%s1458_s2 + $0x60] sm:$0xff]  ;;  %v932_v18 = vpack.c.bf16 %v276_v2, %v275_v63  ;;  %v898_v19 = vpack.c.bf16 %v1177_v4, %v1172_v3 }
  0x12   :  { %891 = vmatprep.subr.bf16.mxu0 %v890_v56  ;;  %v1197_v10 = vld [vmem:[%s1458_s2 + $0x68] sm:$0xff]  ;;  %v1202_v11 = vld [vmem:[%s1457_s1 + $0xe0] sm:$0xff]  ;;  %v1212_v14 = vld [vmem:[%s1458_s2 + $0xf0] sm:$0xff]  ;;  %v934_v23 = vpack.c.bf16 %v1187_v7, %v1182_v6 }
  0x13   :  { %v1207_v12 = vld [vmem:[%s1457_s1 + $0xe8] sm:$0xff]  ;;  %927 = vmatpush3.bf16.msra.mxu1 %v926_v60  ;;  %v1217_v15 = vld [vmem:[%s1458_s2 + $0xf8] sm:$0xff]  ;;  %v1222_v16 = vld [vmem:[%s1457_s1 + $0x60] sm:$0xff]  ;;  %v900_v24 = vpack.c.bf16 %v1197_v10, %v1192_v8 }
  0x14   :  { %929 = vmatprep.subr.bf16.mxu1 %v928_v1  ;;  %v1233_v20 = vld [vmem:[%s1457_s1 + $0x68] sm:$0xff]  ;;  %v1238_v21 = vld [vmem:[%s1458_s2 + $0x70] sm:$0xff]  ;;  %v1243_v22 = vld [vmem:[%s1458_s2 + $0x78] sm:$0xff]  ;;  %v936_v25 = vpack.c.bf16 %v1207_v12, %v1202_v11  ;;  %v902_v26 = vpack.c.bf16 %v1217_v15, %v1212_v14 }
  0x15   :  { %893 = vmatpush3.bf16.msra.mxu0 %v892_v5  ;;  %v741_v27 = vld [vmem:[%s1456_s0 + $0x110] sm:$0xff]  ;;  %v938_v30 = vpack.c.bf16 %v1233_v20, %v1222_v16  ;;  %v904_v31 = vpack.c.bf16 %v1243_v22, %v1238_v21  ;;  %v280_v32 = vld [vmem:[%s1457_s1 + $0xf8] sm:$0xff]  ;;  %v740_v33 = vld [vmem:[%s1456_s0 + $0x108] sm:$0xff] }
  0x16   :  { %v747_v28 = vld [vmem:[%s1456_s0 + $0x230] sm:$0xff]  ;;  %895 = vmatprep.subr.bf16.mxu0 %v894_v9  ;;  %vm81_vm3 = vcmp.eq.f32.partialorder %v741_v27, 255.0  ;;  %v746_v34 = vld [vmem:[%s1456_s0 + $0x228] sm:$0xff]  ;;  %vm80_vm5 = vcmp.eq.f32.partialorder %v740_v33, 255.0  ;;  %v1289_v40 = vld [vmem:[%s1457_s1 + $0x78] sm:$0xff] }
  0x17   :  { %v1263_v29 = vld [vmem:[%s1457_s1 + $0xf0] sm:$0xff]  ;;  %vm87_vm4 = vcmp.eq.f32.partialorder %v747_v28, 255.0  ;;  %931 = vmatpush3.bf16.msra.mxu1 %v930_v13  ;;  %v753_v36 = vsel %vm81_vm3, 1.0, %v983_v35  ;;  %v1294_v41 = vld [vmem:[%s1458_s2 + $0x100] sm:$0xff]  ;;  %vm86_vm6 = vcmp.eq.f32.partialorder %v746_v34, 255.0  ;;  %v1301_v44 = vsel %vm80_vm5, 1.0, %v983_v35 }
  0x18   :  { %v759_v37 = vsel %vm87_vm4, 1.0, %v983_v35  ;;  %v940_v38 = vpack.c.bf16 %v280_v32, %v1263_v29  ;;  %v1284_v39 = vld [vmem:[%s1457_s1 + $0x70] sm:$0xff]  ;;  %933 = vmatprep.subr.bf16.mxu1 %v932_v18  ;;  %v195_v42 = vsel %vm186_vm0, %v753_v36, 0.0  ;;  %v1306_v45 = vld [vmem:[%s1458_s2 + $0x108] sm:$0xff]  ;;  %v738_v46 = vld [vmem:[%s1456_s0 + $0xf8] sm:$0xff]  ;;  %v1312_v50 = vsel %vm86_vm6, 1.0, %v983_v35 }
  0x19   :  { %v201_v43 = vsel %vm186_vm0, %v759_v37, 0.0  ;;  %897 = vmatpush3.bf16.msra.mxu0 %v896_v17  ;;  %v211_v48 = vrot.slane %v195_v42, 4  ;;  %v194_v51 = vsel %vm186_vm0, %v1301_v44, 0.0  ;;  %v744_v52 = vld [vmem:[%s1456_s0 + $0x218] sm:$0xff]  ;;  %v200_v53 = vsel %vm186_vm0, %v1312_v50, 0.0  ;;  %v737_v4 = vld [vmem:[%s1456_s0 + $0xf0] sm:$0xff] }
  0x1a   :  { %v234_v49 = vrot.slane %v201_v43, 4  ;;  %899 = vmatprep.subr.bf16.mxu0 %v898_v19  ;;  %v204_v54 = vrot.slane %v194_v51, 4  ;;  %v942_v55 = vpack.c.bf16 %v1289_v40, %v1284_v39  ;;  %v907_v56 = vpack.c.bf16 %v1306_v45, %v1294_v41  ;;  %v743_v5 = vld [vmem:[%s1456_s0 + $0x210] sm:$0xff] }
  0x1b   :  { %935 = vmatpush3.bf16.msra.mxu1 %v934_v23  ;;  %v212_v57 = vadd.f32 %v211_v48, %v195_v42  ;;  %v227_v59 = vrot.slane %v200_v53, 4  ;;  %vm78_vm8 = vcmp.eq.f32.partialorder %v738_v46, 255.0  ;;  %vm84_vm9 = vcmp.eq.f32.partialorder %v744_v52, 255.0 }
  0x1c   :  { %v235_v58 = vadd.f32 %v234_v49, %v201_v43  ;;  %937 = vmatprep.subr.bf16.mxu1 %v936_v25  ;;  %v205_v60 = vadd.f32 %v204_v54, %v194_v51  ;;  %v750_v61 = vsel %vm78_vm8, 1.0, %v983_v35  ;;  %v130_v62 = vsel %vm119_vm2, %v753_v36, 0.0 }
  0x1d   :  { %901 = vmatpush3.bf16.msra.mxu0 %v900_v24  ;;  %v213_v63 = vrot.slane %v212_v57, 2  ;;  %v228_v2 = vadd.f32 %v227_v59, %v200_v53  ;;  %v756_v3 = vsel %vm84_vm9, 1.0, %v983_v35  ;;  %v127_v7 = vsel %vm116_vm1, %v750_v61, 0.0 }
  0x1e   :  { %v236_v1 = vrot.slane %v235_v58, 2  ;;  %903 = vmatprep.subr.bf16.mxu0 %v902_v26  ;;  %v206_v6 = vrot.slane %v205_v60, 2  ;;  %v133_v8 = vsel %vm116_vm1, %v756_v3, 0.0  ;;  %v136_v9 = vsel %vm119_vm2, %v759_v37, 0.0 }
  0x1f   :  { %12 = vsyncpa [#allocation4], 0  ;;  %939 = vmatpush3.bf16.msra.mxu1 %v938_v30  ;;  %v214_v10 = vadd.f32 %v213_v63, %v212_v57  ;;  %v229_v12 = vrot.slane %v228_v2, 2  ;;  %v145_v13 = vadd.f32 %v130_v62, %v127_v7  ;;  %v169_v15 = vadd.f32 %v136_v9, %v133_v8  ;;  %v319_v33 = vld [vmem:[%s1458_s2 + $0x110] sm:$0xff]  ;;  %v320_v34 = vld [vmem:[%s1458_s2 + $0x118] sm:$0xff]  ;;  %s986_s23 = smov [#allocation3]  }
  0x20   :  { %v237_v11 = vadd.f32 %v236_v1, %v235_v58  ;;  %941 = vmatprep.subr.bf16.mxu1 %v940_v38  ;;  %v207_v14 = vadd.f32 %v206_v6, %v205_v60  ;;  %vm77_vm10 = vcmp.eq.f32.partialorder %v737_v4, 255.0  ;;  %vm83_vm11 = vcmp.eq.f32.partialorder %v743_v5, 255.0  ;;  %v742_v40 = vld [vmem:[%s1456_s0 + $0x118] sm:$0xff]  ;;  %v282_v45 = vld [vmem:[%s1457_s1 + $0x108] sm:$0xff]  ;;  %v739_v62 = vld [vmem:[%s1456_s0 + $0x100] sm:$0xff]  ;;  %s721_s24 = sshll.u32 %s986_s23, 4  ;;  %s722_s24 = int_to_ptr.vmem [resolvable:$true] %s721_s24 }
  0x21   :  { %905 = vmatpush3.bf16.msra.mxu0 %v904_v31  ;;  %v215_v16 = vrot.slane %v214_v10, 1  ;;  %v230_v18 = vadd.f32 %v229_v12, %v228_v2  ;;  %v146_v19 = vrot.slane %v145_v13, 4  ;;  %v984_v23 = vmov 0.0|0.0   ;;  %v748_v42 = vld [vmem:[%s1456_s0 + $0x238] sm:$0xff]  ;;  %v745_v63 = vld [vmem:[%s1456_s0 + $0x220] sm:$0xff]  ;;  %v283_v47 = vld [vmem:[%s1457_s1 + $0x110] sm:$0xff]  ;;  %p964_p1 = scmp.lt.s32.totalorder %s722_s24, %s722_s24 }
  0x22   :  { %v238_v17 = vrot.slane %v237_v11, 1  ;;  %v208_v20 = vrot.slane %v207_v14, 1  ;;  %906 = vmatprep.subr.bf16.mxu0 %v984_v23  ;;  %v170_v24 = vrot.slane %v169_v15, 4  ;;  %v749_v25 = vsel %vm77_vm10, 1.0, %v983_v35  ;;  %v284_v0 = vld [vmem:[%s1457_s1 + $0x118] sm:$0xff]  ;;  %s959_s25 = scalar_lea.vmem %s722_s24, 32 }
  0x23   :  { %v755_v26 = vsel %vm83_vm11, 1.0, %v983_v35  ;;  %v216_v27 = vadd.f32 %v215_v16, %v214_v10  ;;  %v231_v29 = vrot.slane %v230_v18, 1  ;;  %943 = vmatpush3.bf16.msra.mxu1 %v942_v55  ;;  %v147_v30 = vadd.f32 %v146_v19, %v145_v13  ;;  %p960_p0 = scmp.ne.s32.totalorder %s722_s24, %s959_s25  ;;  %p965_p2 = scmp.lt.s32.totalorder %s959_s25, %s959_s25 }
  0x24   :  { %v239_v28 = vadd.f32 %v238_v17, %v237_v11  ;;  %v209_v21 = vadd.f32 %v208_v20, %v207_v14  ;;  %v171_v22 = vadd.f32 %v170_v24, %v169_v15  ;;  %944 = vmatprep.subr.bf16.mxu1 %v984_v23  ;;  %v126_v31 = vsel %vm116_vm1, %v749_v25, 0.0 }
  0x25   :  { %v129_v32 = vsel %vm119_vm2, %v1301_v44, 0.0  ;;  %v232_v37 = vadd.f32 %v231_v29, %v230_v18  ;;  %v148_v38 = vrot.slane %v147_v30, 2  ;;  %v132_v39 = vsel %vm116_vm1, %v755_v26, 0.0  ;;  %p966_p3 = por %p965_p2, %p964_p1 }
  0x26   :  { %v329_v36 = vsel %vm327_vm7, %v239_v28, %v216_v27  ;;  %v172_v43 = vrot.slane %v171_v22, 2  ;;  %v135_v44 = vsel %vm119_vm2, %v1312_v50, 0.0  ;;  %v138_v46 = vadd.f32 %v129_v32, %v126_v31  ;;  %v1380_v50 = vld [vmem:[%s1457_s1 + $0x100] sm:$0xff] }
  0x27   :  { %399 = vmatprep.mubr.f32.mxu0 %v329_v36  ;;  %vm152_vm12 = vcmask 261120   ;;  %v328_v48 = vsel %vm327_vm7, %v232_v37, %v209_v21  ;;  %v149_v49 = vadd.f32 %v148_v38, %v147_v30  ;;  %v162_v51 = vadd.f32 %v135_v44, %v132_v39  ;;  %p967_p4 = pnand %p966_p3, %p960_p0 }
  0x28   :  { %v910_v52 = vpack.c.bf16 %v320_v34, %v319_v33  ;;  %400 = vmatmul.mubr.f32.vlgmr.msra.gmra.mrb[0].mxu0 %v328_v48  ;;  %v173_v53 = vadd.f32 %v172_v43, %v171_v22  ;;  %v139_v54 = vrot.slane %v138_v46, 4  ;;  %vm82_vm13 = vcmp.eq.f32.partialorder %v742_v40, 255.0 }
  0x29   :  { %vm88_vm14 = vcmp.eq.f32.partialorder %v748_v42, 255.0  ;;  %908 = vmatpush3.bf16.msra.mxu0 %v907_v56  ;;  %v150_v55 = vrot.slane %v149_v49, 1  ;;  %v163_v57 = vrot.slane %v162_v51, 4  ;;  %vm985_vm15 = vmmov 0  }
  0x2a   :  { %855 = vmatprep.mubr.msk.f32.mxu0 %vm985_vm15, %v983_v35  ;;  %v754_v58 = vsel %vm82_vm13, 1.0, %v983_v35  ;;  %v760_v59 = vsel %vm88_vm14, 1.0, %v983_v35  ;;  %v174_v60 = vrot.slane %v173_v53, 1  ;;  %909 = vmatprep.subr.bf16.mxu0 %v984_v23  ;;  %v140_v41 = vadd.f32 %v139_v54, %v138_v46 }
  0x2b   :  { %v196_v56 = vsel %vm186_vm0, %v754_v58, 0.0  ;;  %v202_v61 = vsel %vm186_vm0, %v760_v59, 0.0  ;;  %v151_v1 = vadd.f32 %v150_v55, %v149_v49  ;;  %v164_v2 = vadd.f32 %v163_v57, %v162_v51 }
  0x2c   :  { %v218_v3 = vsel %vm152_vm12, %v196_v56, 0.0  ;;  %v241_v4 = vsel %vm152_vm12, %v202_v61, 0.0  ;;  %v175_v5 = vadd.f32 %v174_v60, %v173_v53  ;;  %v141_v6 = vrot.slane %v140_v41, 2 }
  0x2d   :  { %v220_v7 = vrot.slane %v218_v3, 4  ;;  %v243_v8 = vrot.slane %v241_v4, 4  ;;  %v165_v9 = vrot.slane %v164_v2, 2  ;;  %v945_v10 = vpack.c.bf16 %v282_v45, %v1380_v50  ;;  %911 = vmatpush3.bf16.msra.mxu0 %v910_v52 }
  0x2e   :  { %vm79_vm0 = vcmp.eq.f32.partialorder %v739_v62, 255.0  ;;  %vm85_vm3 = vcmp.eq.f32.partialorder %v745_v63, 255.0  ;;  %v482_v11 = vsel %vm327_vm7, %v175_v5, %v151_v1  ;;  %v142_v12 = vadd.f32 %v141_v6, %v140_v41  ;;  %869 = vmatprep.subr.mxu0 %v983_v35 }
  0x2f   :  { %v221_v13 = vadd.f32 %v220_v7, %v218_v3  ;;  %v244_v14 = vadd.f32 %v243_v8, %v241_v4  ;;  %552 = vmatprep.mubr.f32.mxu1 %v482_v11  ;;  %v166_v15 = vadd.f32 %v165_v9, %v164_v2  ;;  %v751_v16 = vsel %vm79_vm0, 1.0, %v983_v35 }
  0x30   :  { %v757_v17 = vsel %vm85_vm3, 1.0, %v983_v35  ;;  %v131_v18 = vsel %vm119_vm2, %v754_v58, 0.0  ;;  %v143_v19 = vrot.slane %v142_v12, 1  ;;  %v128_v25 = vsel %vm116_vm1, %v751_v16, 0.0 }
  0x31   :  { %v222_v20 = vrot.slane %v221_v13, 2  ;;  %v245_v24 = vrot.slane %v244_v14, 2  ;;  %v167_v26 = vrot.slane %v166_v15, 1  ;;  %v134_v27 = vsel %vm116_vm1, %v757_v17, 0.0 }
  0x32   :  { %v137_v28 = vsel %vm119_vm2, %v760_v59, 0.0  ;;  %v153_v29 = vsel %vm152_vm12, %v128_v25, 0.0  ;;  %v144_v30 = vadd.f32 %v143_v19, %v142_v12  ;;  %v154_v31 = vsel %vm152_vm12, %v131_v18, 0.0 }
  0x33   :  { %v223_v21 = vadd.f32 %v222_v20, %v221_v13  ;;  %v246_v22 = vadd.f32 %v245_v24, %v244_v14  ;;  %v168_v32 = vadd.f32 %v167_v26, %v166_v15  ;;  %v155_v33 = vadd.f32 %v154_v31, %v153_v29 }
  0x34   :  { %v176_v34 = vsel %vm152_vm12, %v134_v27, 0.0  ;;  %v177_v36 = vsel %vm152_vm12, %v137_v28, 0.0  ;;  %v948_v48 = vpack.c.bf16 %v284_v0, %v283_v47  ;;  %vm639_vm1 = vcmask 64512  }
  0x35   :  { %v224_v37 = vrot.slane %v223_v21, 1  ;;  %v247_v38 = vrot.slane %v246_v22, 1  ;;  %v178_v39 = vadd.f32 %v177_v36, %v176_v34  ;;  %v481_v40 = vsel %vm327_vm7, %v168_v32, %v144_v30 }
  0x36   :  { %v156_v42 = vrot.slane %v155_v33, 4  ;;  %553 = vmatmul.mubr.f32.vlgmr.msra.gmra.mrb[0].mxu1 %v481_v40  ;;  %vm629_vm2 = vcmask 58368   ;;  %vm713_vm4 = vcmask 33792  }
  0x37   :  { %v225_v43 = vadd.f32 %v224_v37, %v223_v21  ;;  %v248_v44 = vadd.f32 %v247_v38, %v246_v22  ;;  %v179_v46 = vrot.slane %v178_v39, 4  ;;  %946 = vmatpush3.bf16.msra.mxu1 %v945_v10  ;;  %866 = vmatprep.mubr.msk.f32.mxu1 %vm985_vm15, %v983_v35  ;;  %v763_v10 = vld [vmem:[%s1460_s4] ss:$0 sm:$0xff] }
  0x38   :  { %v157_v49 = vadd.f32 %v156_v42, %v155_v33  ;;  %947 = vmatprep.subr.bf16.mxu1 %v984_v23  ;;  %v631_v23 = vld [vmem:[%s1459_s3] sm:$0xff] }
  0x39   :  { %v330_v51 = vsel %vm327_vm7, %v248_v44, %v225_v43  ;;  %v180_v52 = vadd.f32 %v179_v46, %v178_v39 }
  0x3a   :  { %856 = vmatmul.mubr.msk.f32.vlgmr.msra.gmra.mrb[2].mxu0 %vm152_vm12, %v330_v51  ;;  %v158_v53 = vrot.slane %v157_v49, 2 }
  0x3b   :  { %v181_v54 = vrot.slane %v180_v52, 2  ;;  %871 = vmatprep.mubr.msk.f32.mxu0 %vm985_vm15, %v983_v35  ;;  %949 = vmatpush3.bf16.msra.mxu1 %v948_v48 }
  0x3c   :  { %v159_v55 = vadd.f32 %v158_v53, %v157_v49  ;;  %870 = vmatpush3.msra.mxu0 %v631_v23 }
  0x3d   :  { %v182_v57 = vadd.f32 %v181_v54, %v180_v52 }
  0x3e   :  { %v160_v50 = vrot.slane %v159_v55, 1 }
  0x3f   :  { %v183_v58 = vrot.slane %v182_v57, 1 }
  0x40   :  { %v161_v59 = vadd.f32 %v160_v50, %v159_v55 }
  0x41   :  { %v184_v60 = vadd.f32 %v183_v58, %v182_v57 }
  0x43   :  { %v483_v41 = vsel %vm327_vm7, %v184_v60, %v161_v59 }
  0x44   :  { %867 = vmatmul.mubr.msk.f32.vlgmr.msra.gmra.mrb[2].mxu1 %vm152_vm12, %v483_v41 }
  0xfb   :  { %v797_v45 = vpop.f32.mrb[0].mxu0 }
  0xfc   :  { %v798_v56 = vpop.f32.mrb[1].mxu0 }
  0xfd   :  { %v799_v61 = vadd.f32 %v798_v56, %v797_v45 }
 0x109   :  { %v837_v35 = vpop.f32.mrb[0].mxu1 }
 0x10a   :  { %v838_v62 = vpop.f32.mrb[1].mxu1 }
 0x10b   :  { %v839_v63 = vadd.f32 %v838_v62, %v837_v35 }
 0x10d   :  { %v471_v1 = vpop.f32.mrb[2].mxu0 }
 0x10e   :  { %v472_v2 = vadd.f32 %v799_v61, %v471_v1  ;;  %v857_v3 = vpop.f32.mrb[3].mxu0 }
 0x110   :  { %v555_v4 = vadd.f32 %v839_v63, %v472_v2 }
 0x117   :  { %v624_v5 = vpop.f32.mrb[2].mxu1 }
 0x118   :  { %v625_v6 = vadd.f32 %v624_v5, %v555_v4  ;;  %v868_v7 = vpop.f32.mrb[3].mxu1 }
 0x11a   :  { %v953_v8 = vtrunc.f32 %v625_v6  ;;  %872 = vmatmul.mubr.msk.f32.vlgmr.msra.gmra.mrb[4].mxu0 %vm639_vm1, %v625_v6 }
 0x11c   :  { %v954_v9 = vcvt.f32.s32 %v953_v8 }
 0x11e   :  { %630 = vst.msk [vmem:[%s1462_s6] sm:$0x3] %vm629_vm2, %v954_v9 }
 0x1ed   :  { %v709_v11 = vpop.f32.mrb[4].mxu0 }
 0x1ee   :  { %v710_v12 = vadd.f32 %v763_v10, %v709_v11  ;;  %v873_v13 = vpop.f32.mrb[5].mxu0 }
 0x1f0   :  { %714 = vst.msk [vmem:[#allocation3] sm:$0x3] %vm713_vm4, %v710_v12 }
 0x1f1   :  { %970 = shalt.err (!%p967_p4)
}
 0x1f2   :  { %s971_s27 = scalar_lea.hbm %s1461_s5, 32 }
 0x1f3   :  { %p972_p5 = scmp.ne.s32.totalorder %s1461_s5, %s971_s27  ;;  %p975_p6 = scmp.lt.u32.totalorder %s971_s27, %s1461_s5 }
 0x1f5   :  { %p977_p7 = pnand %p975_p6, %p972_p5 }
 0x1f7   :  { %980 = shalt.err (!%p977_p7)
}
 0x1f8   :  { %724 = dma.vmem_to_hbm [thread:$0]  %s722_s24, 32, %s1461_s5, [#allocation4]  }
 0x1f9   :  { %981 = dma.done.wait [#allocation4], 32  }
 0x1fa   :  { %982 = vsyncadd [#allocation4], 4294967264 }
 0x1fb   :  { %732 = vsyncpa [#allocation4], 1 }

</bundles_post_ra>
